<compile_context>
chip_gen: v5e
topology: v5e:2x2
jax: 0.10.0
libtpu: 0.0.40
codegen_flags: <defaults>
</compile_context>

<pallas_src>
import jax
import jax.numpy as jnp
from jax.experimental import pallas as pl
from jax.experimental.pallas import tpu as pltpu

_LANE = 128
_HIDDEN1 = 128
_BOTTLENECK = 64  # zero-padded to 128 on the kernel path


def _round_up(n, m):
    return ((n + m - 1) // m) * m


def _mlp_kernel(x_ref, w1_ref, b1_ref, w2_ref, b2_ref,
                w3_ref, b3_ref, w4_ref, b4_ref, o_ref):
    cdt = w1_ref.dtype  # MXU input dtype (bf16); accumulation stays f32

    # fused input cast (x arrives as f32 straight from HBM)
    x = x_ref[...].astype(cdt)

    # encoder layer 1: (tm, D) @ (D, 128) -> f32 acc, bias + ReLU in f32
    h = jnp.dot(x, w1_ref[...], preferred_element_type=jnp.float32)
    h = jnp.maximum(h + b1_ref[...], 0.0).astype(cdt)

    # encoder layer 2: bottleneck zero-padded 64 -> 128 (full-lane matmul)
    h = jnp.dot(h, w2_ref[...], preferred_element_type=jnp.float32)
    h = jnp.maximum(h + b2_ref[...], 0.0).astype(cdt)

    # decoder layer 1: (tm, 128) @ (128, 128)
    h = jnp.dot(h, w3_ref[...], preferred_element_type=jnp.float32)
    h = jnp.maximum(h + b3_ref[...], 0.0).astype(cdt)

    # decoder layer 2 (no activation): (tm, 128) @ (128, Dp), lane-dense store
    o_ref[...] = (jnp.dot(h, w4_ref[...], preferred_element_type=jnp.float32)
                  + b4_ref[...]).astype(o_ref.dtype)


def prepare_params(params, input_dim, compute_dtype=jnp.bfloat16):
    """Zero-pad (bottleneck 64->128, output D->Dp) and cast weights to
    compute_dtype. Biases stay f32 (bias add / ReLU done in f32 in-kernel).
    The input feature dim (w1 rows) is left unpadded; x is consumed as-is."""
    D = input_dim
    Dp = _round_up(D, _LANE)
    pad64 = _LANE - _BOTTLENECK

    def padw(w, rpad, cpad):
        return jnp.pad(w, ((0, rpad), (0, cpad))).astype(compute_dtype)

    def padb(b, cpad):
        return jnp.pad(b, ((0, 0), (0, cpad))).astype(jnp.float32)

    pp = dict(
        w1=padw(params["w1"], 0, 0),            # (D, 128)
        b1=padb(params["b1"], 0),               # (1, 128)
        w2=padw(params["w2"], 0, pad64),         # (128, 128)
        b2=padb(params["b2"], pad64),            # (1, 128)
        w3=padw(params["w3"], pad64, 0),         # (128, 128)
        b3=padb(params["b3"], 0),               # (1, 128)
        w4=padw(params["w4"], 0, Dp - D),        # (128, Dp)
        b4=padb(params["b4"], Dp - D),           # (1, Dp)
    )
    return pp, Dp


def _vmem_capacity_bytes():
    try:
        return int(pltpu.get_tpu_info().vmem_capacity_bytes)
    except Exception:
        return 64 << 20  # conservative fallback: assume v7x (smallest VMEM)


def _pick_tm(B, D, Dp, out_bytes, param_bytes, vmem_cap):
    """Balanced batch tiling: large tiles (amortize ~0.35us/step, fill the MXU
    M dim), minimal batch padding, >=2 grid steps (v7x dual-TC), VMEM-guarded."""
    if Dp <= 256:
        tm_max = 2048
    elif Dp <= 1024:
        tm_max = 1024
    else:
        tm_max = 512

    if B <= 8:
        tm = 8
    else:
        # >=2 steps so the "parallel" grid axis shards across both v7x cores;
        # negligible extra step overhead on single-TC v5e/v6e.
        n_steps = max(2, pl.cdiv(B, tm_max))
        tm = _round_up(pl.cdiv(B, n_steps), 8)

    # Generation-aware budget: ~40 MiB on v7x (64 MiB physical),
    # ~88 MiB on v5e/v6e (128 MiB physical).
    budget = (88 << 20) if vmem_cap >= (96 << 20) else (40 << 20)

    def est(t):
        io = 2 * t * D * 4 + 2 * t * Dp * out_bytes   # double-buffered x (f32) + out
        inter = 6 * t * _LANE * 4                     # f32 intermediates / bf16 recasts
        return io + param_bytes + inter               # weights single-buffered

    while tm > 8 and est(tm) > budget:
        tm = max(8, (tm // 2 // 8) * 8)
    return tm, est(tm)


def adaptive_imputer_forward(x, params, *, compute_dtype=jnp.bfloat16,
                             out_dtype=None):
    """x: (B, D) float32. params: dict of transposed weights / biases.
    out_dtype=jnp.bfloat16 halves the output write stream if the caller
    accepts it; default matches x.dtype (f32, like the PyTorch module)."""
    B, D = x.shape
    out_dtype = jnp.dtype(x.dtype if out_dtype is None else out_dtype)
    pp, Dp = prepare_params(params, D, compute_dtype)

    param_bytes = sum(int(v.size) * v.dtype.itemsize for v in pp.values())
    vmem_cap = _vmem_capacity_bytes()
    tm, est = _pick_tm(B, D, Dp, out_dtype.itemsize, param_bytes, vmem_cap)

    Bp = _round_up(B, tm)
    xp = x if Bp == B else jnp.pad(x, ((0, Bp - B), (0, 0)))

    cap = (100 << 20) if vmem_cap >= (96 << 20) else (48 << 20)
    vmem_limit = int(min(max(int(1.5 * est), 16 << 20), cap))

    # TODO(synk): if an xprof trace shows exposed DMA at grid-step boundaries,
    # set pipeline_mode=pl.Buffered(3) on the x in_spec / out_spec.
    def run(single_buffer_weights):
        if single_buffer_weights:
            # Constant block index -> double buffering buys nothing; Buffered(1)
            # halves resident weight VMEM (matters for wide D on v7x's 64 MiB).
            const = lambda a: pl.BlockSpec(a.shape, lambda i: (0, 0),
                                           pipeline_mode=pl.Buffered(1))
        else:
            const = lambda a: pl.BlockSpec(a.shape, lambda i: (0, 0))

        return pl.pallas_call(
            _mlp_kernel,
            out_shape=jax.ShapeDtypeStruct((Bp, Dp), out_dtype),
            grid_spec=pltpu.PrefetchScalarGridSpec(
                num_scalar_prefetch=0,
                grid=(Bp // tm,),
                in_specs=[
                    pl.BlockSpec((tm, D), lambda i: (i, 0)),   # x tile (f32)
                    const(pp["w1"]), const(pp["b1"]),
                    const(pp["w2"]), const(pp["b2"]),
                    const(pp["w3"]), const(pp["b3"]),
                    const(pp["w4"]), const(pp["b4"]),
                ],
                out_specs=pl.BlockSpec((tm, Dp), lambda i: (i, 0)),
            ),
            compiler_params=pltpu.CompilerParams(
                dimension_semantics=("parallel",),
                vmem_limit_bytes=vmem_limit),
        )(xp, pp["w1"], pp["b1"], pp["w2"], pp["b2"],
          pp["w3"], pp["b3"], pp["w4"], pp["b4"])

    try:
        out = run(single_buffer_weights=True)
    except Exception:
        # Fallback if this JAX build rejects pipeline_mode=pl.Buffered(1).
        out = run(single_buffer_weights=False)

    return out[:B, :D]


def init_params(key, input_dim):
    """Deterministic synthetic init (shapes match AdaptiveImputer.__init__),
    stored transposed: W is (in_features, out_features)."""
    ks = jax.random.split(key, 8)

    def lin(kw, kb, fan_in, fan_out):
        bound = 1.0 / jnp.sqrt(fan_in)
        w = jax.random.uniform(kw, (fan_in, fan_out), jnp.float32, -bound, bound)
        b = jax.random.uniform(kb, (1, fan_out), jnp.float32, -bound, bound)
        return w, b

    w1, b1 = lin(ks[0], ks[1], input_dim, _HIDDEN1)
    w2, b2 = lin(ks[2], ks[3], _HIDDEN1, _BOTTLENECK)
    w3, b3 = lin(ks[4], ks[5], _BOTTLENECK, _HIDDEN1)
    w4, b4 = lin(ks[6], ks[7], _HIDDEN1, input_dim)
    return dict(w1=w1, b1=b1, w2=w2, b2=b2, w3=w3, b3=b3, w4=w4, b4=b4)


def reference_forward(x, p, compute_dtype=jnp.float32):
    """Pure-JAX reference. compute_dtype mirrors the kernel's MXU input dtype
    (f32 accumulation either way)."""
    cd = compute_dtype

    def lin(h, w, b):
        return jnp.dot(h.astype(cd), w.astype(cd),
                       preferred_element_type=jnp.float32) + b

    h = jnp.maximum(lin(x, p["w1"], p["b1"]), 0.0)
    h = jnp.maximum(lin(h, p["w2"], p["b2"]), 0.0)
    h = jnp.maximum(lin(h, p["w3"], p["b3"]), 0.0)
    return lin(h, p["w4"], p["b4"])


if __name__ == "__main__":
    key = jax.random.PRNGKey(0)
    k_x, k_p = jax.random.split(key)

    B, D = 16, 32                      # small demo: batch=16, input_dim=32
    x = jax.random.normal(k_x, (B, D), dtype=jnp.float32)
    params = init_params(k_p, D)

    out = adaptive_imputer_forward(x, params)
    out = jax.block_until_ready(out)
    assert out.shape == (B, D)
    assert out.dtype == x.dtype

    # bf16-mirrored reference (same roundings) -> tight tolerance
    ref_bf16 = reference_forward(x, params, compute_dtype=jnp.bfloat16)
    assert jnp.allclose(out, ref_bf16, atol=2e-3, rtol=2e-3)

    # full-f32 reference -> loose tolerance (bf16 MXU inputs)
    ref_f32 = reference_forward(x, params, compute_dtype=jnp.float32)
    assert jnp.allclose(out, ref_f32, atol=5e-2, rtol=5e-2)

    print("KERNEL_OK")
</pallas_src>

<mosaic_0001>
module attributes {stable_mosaic.version = 11 : i64} {
  func.func @_mlp_kernel(%arg0: i32, %arg1: memref<8x32xf32, #tpu.memory_space<vmem>>, %arg2: memref<32x128xbf16, #tpu.memory_space<vmem>>, %arg3: memref<1x128xf32, #tpu.memory_space<vmem>>, %arg4: memref<128x128xbf16, #tpu.memory_space<vmem>>, %arg5: memref<1x128xf32, #tpu.memory_space<vmem>>, %arg6: memref<128x128xbf16, #tpu.memory_space<vmem>>, %arg7: memref<1x128xf32, #tpu.memory_space<vmem>>, %arg8: memref<128x128xbf16, #tpu.memory_space<vmem>>, %arg9: memref<1x128xf32, #tpu.memory_space<vmem>>, %arg10: memref<8x128xf32, #tpu.memory_space<vmem>>) attributes {dimension_semantics = [#tpu.dimension_semantics<parallel>], iteration_bounds = array<i64: 2>, scalar_prefetch = 0 : i64, scratch_operands = 0 : i64, tpu.core_type = #tpu.core_type<tc>, window_params = [{transform_indices = @transform_0, window_bounds = array<i64: 8, 32>}, {pipeline_mode = #tpu.pipeline_mode<synchronous>, transform_indices = @transform_1, window_bounds = array<i64: 32, 128>}, {pipeline_mode = #tpu.pipeline_mode<synchronous>, transform_indices = @transform_2, window_bounds = array<i64: 1, 128>}, {pipeline_mode = #tpu.pipeline_mode<synchronous>, transform_indices = @transform_3, window_bounds = array<i64: 128, 128>}, {pipeline_mode = #tpu.pipeline_mode<synchronous>, transform_indices = @transform_4, window_bounds = array<i64: 1, 128>}, {pipeline_mode = #tpu.pipeline_mode<synchronous>, transform_indices = @transform_5, window_bounds = array<i64: 128, 128>}, {pipeline_mode = #tpu.pipeline_mode<synchronous>, transform_indices = @transform_6, window_bounds = array<i64: 1, 128>}, {pipeline_mode = #tpu.pipeline_mode<synchronous>, transform_indices = @transform_7, window_bounds = array<i64: 128, 128>}, {pipeline_mode = #tpu.pipeline_mode<synchronous>, transform_indices = @transform_8, window_bounds = array<i64: 1, 128>}, {transform_indices = @transform_9, window_bounds = array<i64: 8, 128>}]} {
    %c0 = arith.constant 0 : index
    %c0_0 = arith.constant 0 : index
    %0 = vector.load %arg1[%c0, %c0_0] : memref<8x32xf32, #tpu.memory_space<vmem>>, vector<8x32xf32>
    %1 = arith.truncf %0 : vector<8x32xf32> to vector<8x32xbf16>
    %c0_1 = arith.constant 0 : index
    %c0_2 = arith.constant 0 : index
    %2 = vector.load %arg2[%c0_1, %c0_2] : memref<32x128xbf16, #tpu.memory_space<vmem>>, vector<32x128xbf16>
    %cst = arith.constant dense<0.000000e+00> : vector<8x128xf32>
    %3 = tpu.matmul %1, %2, %cst {dimension_numbers = #tpu.dot_dimension_numbers<[1], [0], [0], [1], [0, 0, 1, 1], [], []>} : vector<8x32xbf16>, vector<32x128xbf16>, vector<8x128xf32> -> vector<8x128xf32>
    %c0_3 = arith.constant 0 : index
    %c0_4 = arith.constant 0 : index
    %4 = vector.load %arg3[%c0_3, %c0_4] : memref<1x128xf32, #tpu.memory_space<vmem>>, vector<1x128xf32>
    %5 = vector.broadcast %4 : vector<1x128xf32> to vector<8x128xf32>
    %6 = arith.addf %3, %5 : vector<8x128xf32>
    %cst_5 = arith.constant 0.000000e+00 : f32
    %7 = vector.broadcast %cst_5 : f32 to vector<8x128xf32>
    %8 = arith.maximumf %6, %7 : vector<8x128xf32>
    %9 = arith.truncf %8 : vector<8x128xf32> to vector<8x128xbf16>
    %c0_6 = arith.constant 0 : index
    %c0_7 = arith.constant 0 : index
    %10 = vector.load %arg4[%c0_6, %c0_7] : memref<128x128xbf16, #tpu.memory_space<vmem>>, vector<128x128xbf16>
    %cst_8 = arith.constant dense<0.000000e+00> : vector<8x128xf32>
    %11 = tpu.matmul %9, %10, %cst_8 {dimension_numbers = #tpu.dot_dimension_numbers<[1], [0], [0], [1], [0, 0, 1, 1], [], []>} : vector<8x128xbf16>, vector<128x128xbf16>, vector<8x128xf32> -> vector<8x128xf32>
    %c0_9 = arith.constant 0 : index
    %c0_10 = arith.constant 0 : index
    %12 = vector.load %arg5[%c0_9, %c0_10] : memref<1x128xf32, #tpu.memory_space<vmem>>, vector<1x128xf32>
    %13 = vector.broadcast %12 : vector<1x128xf32> to vector<8x128xf32>
    %14 = arith.addf %11, %13 : vector<8x128xf32>
    %cst_11 = arith.constant 0.000000e+00 : f32
    %15 = vector.broadcast %cst_11 : f32 to vector<8x128xf32>
    %16 = arith.maximumf %14, %15 : vector<8x128xf32>
    %17 = arith.truncf %16 : vector<8x128xf32> to vector<8x128xbf16>
    %c0_12 = arith.constant 0 : index
    %c0_13 = arith.constant 0 : index
    %18 = vector.load %arg6[%c0_12, %c0_13] : memref<128x128xbf16, #tpu.memory_space<vmem>>, vector<128x128xbf16>
    %cst_14 = arith.constant dense<0.000000e+00> : vector<8x128xf32>
    %19 = tpu.matmul %17, %18, %cst_14 {dimension_numbers = #tpu.dot_dimension_numbers<[1], [0], [0], [1], [0, 0, 1, 1], [], []>} : vector<8x128xbf16>, vector<128x128xbf16>, vector<8x128xf32> -> vector<8x128xf32>
    %c0_15 = arith.constant 0 : index
    %c0_16 = arith.constant 0 : index
    %20 = vector.load %arg7[%c0_15, %c0_16] : memref<1x128xf32, #tpu.memory_space<vmem>>, vector<1x128xf32>
    %21 = vector.broadcast %20 : vector<1x128xf32> to vector<8x128xf32>
    %22 = arith.addf %19, %21 : vector<8x128xf32>
    %cst_17 = arith.constant 0.000000e+00 : f32
    %23 = vector.broadcast %cst_17 : f32 to vector<8x128xf32>
    %24 = arith.maximumf %22, %23 : vector<8x128xf32>
    %25 = arith.truncf %24 : vector<8x128xf32> to vector<8x128xbf16>
    %c0_18 = arith.constant 0 : index
    %c0_19 = arith.constant 0 : index
    %26 = vector.load %arg8[%c0_18, %c0_19] : memref<128x128xbf16, #tpu.memory_space<vmem>>, vector<128x128xbf16>
    %cst_20 = arith.constant dense<0.000000e+00> : vector<8x128xf32>
    %27 = tpu.matmul %25, %26, %cst_20 {dimension_numbers = #tpu.dot_dimension_numbers<[1], [0], [0], [1], [0, 0, 1, 1], [], []>} : vector<8x128xbf16>, vector<128x128xbf16>, vector<8x128xf32> -> vector<8x128xf32>
    %c0_21 = arith.constant 0 : index
    %c0_22 = arith.constant 0 : index
    %28 = vector.load %arg9[%c0_21, %c0_22] : memref<1x128xf32, #tpu.memory_space<vmem>>, vector<1x128xf32>
    %29 = vector.broadcast %28 : vector<1x128xf32> to vector<8x128xf32>
    %30 = arith.addf %27, %29 : vector<8x128xf32>
    %c0_23 = arith.constant 0 : index
    %c0_24 = arith.constant 0 : index
    %31 = vector.load %arg10[%c0_23, %c0_24] : memref<8x128xf32, #tpu.memory_space<vmem>>, vector<8x128xf32>
    tpu.vector_store %arg10[%c0_23, %c0_24], %30 {strides = array<i32>} : memref<8x128xf32, #tpu.memory_space<vmem>>, vector<8x128xf32>,
    return
  }
  func.func @transform_0(%arg0: i32) -> (i32, i32) {
    %c0_i32 = arith.constant 0 : i32
    %c0_i32_0 = arith.constant 0 : i32
    return %arg0, %c0_i32 : i32, i32
  }
  func.func @transform_1(%arg0: i32) -> (i32, i32) {
    %c0_i32 = arith.constant 0 : i32
    %c0_i32_0 = arith.constant 0 : i32
    %c0_i32_1 = arith.constant 0 : i32
    return %c0_i32, %c0_i32_0 : i32, i32
  }
  func.func @transform_2(%arg0: i32) -> (i32, i32) {
    %c0_i32 = arith.constant 0 : i32
    %c0_i32_0 = arith.constant 0 : i32
    %c0_i32_1 = arith.constant 0 : i32
    return %c0_i32, %c0_i32_0 : i32, i32
  }
  func.func @transform_3(%arg0: i32) -> (i32, i32) {
    %c0_i32 = arith.constant 0 : i32
    %c0_i32_0 = arith.constant 0 : i32
    %c0_i32_1 = arith.constant 0 : i32
    return %c0_i32, %c0_i32_0 : i32, i32
  }
  func.func @transform_4(%arg0: i32) -> (i32, i32) {
    %c0_i32 = arith.constant 0 : i32
    %c0_i32_0 = arith.constant 0 : i32
    %c0_i32_1 = arith.constant 0 : i32
    return %c0_i32, %c0_i32_0 : i32, i32
  }
  func.func @transform_5(%arg0: i32) -> (i32, i32) {
    %c0_i32 = arith.constant 0 : i32
    %c0_i32_0 = arith.constant 0 : i32
    %c0_i32_1 = arith.constant 0 : i32
    return %c0_i32, %c0_i32_0 : i32, i32
  }
  func.func @transform_6(%arg0: i32) -> (i32, i32) {
    %c0_i32 = arith.constant 0 : i32
    %c0_i32_0 = arith.constant 0 : i32
    %c0_i32_1 = arith.constant 0 : i32
    return %c0_i32, %c0_i32_0 : i32, i32
  }
  func.func @transform_7(%arg0: i32) -> (i32, i32) {
    %c0_i32 = arith.constant 0 : i32
    %c0_i32_0 = arith.constant 0 : i32
    %c0_i32_1 = arith.constant 0 : i32
    return %c0_i32, %c0_i32_0 : i32, i32
  }
  func.func @transform_8(%arg0: i32) -> (i32, i32) {
    %c0_i32 = arith.constant 0 : i32
    %c0_i32_0 = arith.constant 0 : i32
    %c0_i32_1 = arith.constant 0 : i32
    return %c0_i32, %c0_i32_0 : i32, i32
  }
  func.func @transform_9(%arg0: i32) -> (i32, i32) {
    %c0_i32 = arith.constant 0 : i32
    %c0_i32_0 = arith.constant 0 : i32
    return %arg0, %c0_i32 : i32, i32
  }
}

module attributes {stable_mosaic.version = 11 : i64} {
  func.func @_mlp_kernel(%arg0: i32, %arg1: memref<8x32xf32, #tpu.memory_space<vmem>>, %arg2: memref<32x128xbf16, #tpu.memory_space<vmem>>, %arg3: memref<1x128xf32, #tpu.memory_space<vmem>>, %arg4: memref<128x128xbf16, #tpu.memory_space<vmem>>, %arg5: memref<1x128xf32, #tpu.memory_space<vmem>>, %arg6: memref<128x128xbf16, #tpu.memory_space<vmem>>, %arg7: memref<1x128xf32, #tpu.memory_space<vmem>>, %arg8: memref<128x128xbf16, #tpu.memory_space<vmem>>, %arg9: memref<1x128xf32, #tpu.memory_space<vmem>>, %arg10: memref<8x128xf32, #tpu.memory_space<vmem>>) attributes {dimension_semantics = [#tpu.dimension_semantics<parallel>], iteration_bounds = array<i64: 2>, scalar_prefetch = 0 : i64, scratch_operands = 0 : i64, tpu.core_type = #tpu.core_type<tc>, window_params = [{transform_indices = @transform_0, window_bounds = array<i64: 8, 32>}, {pipeline_mode = #tpu.pipeline_mode<synchronous>, transform_indices = @transform_1, window_bounds = array<i64: 32, 128>}, {pipeline_mode = #tpu.pipeline_mode<synchronous>, transform_indices = @transform_2, window_bounds = array<i64: 1, 128>}, {pipeline_mode = #tpu.pipeline_mode<synchronous>, transform_indices = @transform_3, window_bounds = array<i64: 128, 128>}, {pipeline_mode = #tpu.pipeline_mode<synchronous>, transform_indices = @transform_4, window_bounds = array<i64: 1, 128>}, {pipeline_mode = #tpu.pipeline_mode<synchronous>, transform_indices = @transform_5, window_bounds = array<i64: 128, 128>}, {pipeline_mode = #tpu.pipeline_mode<synchronous>, transform_indices = @transform_6, window_bounds = array<i64: 1, 128>}, {pipeline_mode = #tpu.pipeline_mode<synchronous>, transform_indices = @transform_7, window_bounds = array<i64: 128, 128>}, {pipeline_mode = #tpu.pipeline_mode<synchronous>, transform_indices = @transform_8, window_bounds = array<i64: 1, 128>}, {transform_indices = @transform_9, window_bounds = array<i64: 8, 128>}]} {
    %c0 = arith.constant 0 : index
    %c0_0 = arith.constant 0 : index
    %0 = vector.load %arg1[%c0, %c0_0] : memref<8x32xf32, #tpu.memory_space<vmem>>, vector<8x32xf32>
    %1 = arith.truncf %0 : vector<8x32xf32> to vector<8x32xbf16>
    %c0_1 = arith.constant 0 : index
    %c0_2 = arith.constant 0 : index
    %2 = vector.load %arg2[%c0_1, %c0_2] : memref<32x128xbf16, #tpu.memory_space<vmem>>, vector<32x128xbf16>
    %cst = arith.constant dense<0.000000e+00> : vector<8x128xf32>
    %3 = tpu.matmul %1, %2, %cst {dimension_numbers = #tpu.dot_dimension_numbers<[1], [0], [0], [1], [0, 0, 1, 1], [], []>} : vector<8x32xbf16>, vector<32x128xbf16>, vector<8x128xf32> -> vector<8x128xf32>
    %c0_3 = arith.constant 0 : index
    %c0_4 = arith.constant 0 : index
    %4 = vector.load %arg3[%c0_3, %c0_4] : memref<1x128xf32, #tpu.memory_space<vmem>>, vector<1x128xf32>
    %5 = vector.broadcast %4 : vector<1x128xf32> to vector<8x128xf32>
    %6 = arith.addf %3, %5 : vector<8x128xf32>
    %cst_5 = arith.constant 0.000000e+00 : f32
    %7 = vector.broadcast %cst_5 : f32 to vector<8x128xf32>
    %8 = arith.maximumf %6, %7 : vector<8x128xf32>
    %9 = arith.truncf %8 : vector<8x128xf32> to vector<8x128xbf16>
    %c0_6 = arith.constant 0 : index
    %c0_7 = arith.constant 0 : index
    %10 = vector.load %arg4[%c0_6, %c0_7] : memref<128x128xbf16, #tpu.memory_space<vmem>>, vector<128x128xbf16>
    %cst_8 = arith.constant dense<0.000000e+00> : vector<8x128xf32>
    %11 = tpu.matmul %9, %10, %cst_8 {dimension_numbers = #tpu.dot_dimension_numbers<[1], [0], [0], [1], [0, 0, 1, 1], [], []>} : vector<8x128xbf16>, vector<128x128xbf16>, vector<8x128xf32> -> vector<8x128xf32>
    %c0_9 = arith.constant 0 : index
    %c0_10 = arith.constant 0 : index
    %12 = vector.load %arg5[%c0_9, %c0_10] : memref<1x128xf32, #tpu.memory_space<vmem>>, vector<1x128xf32>
    %13 = vector.broadcast %12 : vector<1x128xf32> to vector<8x128xf32>
    %14 = arith.addf %11, %13 : vector<8x128xf32>
    %cst_11 = arith.constant 0.000000e+00 : f32
    %15 = vector.broadcast %cst_11 : f32 to vector<8x128xf32>
    %16 = arith.maximumf %14, %15 : vector<8x128xf32>
    %17 = arith.truncf %16 : vector<8x128xf32> to vector<8x128xbf16>
    %c0_12 = arith.constant 0 : index
    %c0_13 = arith.constant 0 : index
    %18 = vector.load %arg6[%c0_12, %c0_13] : memref<128x128xbf16, #tpu.memory_space<vmem>>, vector<128x128xbf16>
    %cst_14 = arith.constant dense<0.000000e+00> : vector<8x128xf32>
    %19 = tpu.matmul %17, %18, %cst_14 {dimension_numbers = #tpu.dot_dimension_numbers<[1], [0], [0], [1], [0, 0, 1, 1], [], []>} : vector<8x128xbf16>, vector<128x128xbf16>, vector<8x128xf32> -> vector<8x128xf32>
    %c0_15 = arith.constant 0 : index
    %c0_16 = arith.constant 0 : index
    %20 = vector.load %arg7[%c0_15, %c0_16] : memref<1x128xf32, #tpu.memory_space<vmem>>, vector<1x128xf32>
    %21 = vector.broadcast %20 : vector<1x128xf32> to vector<8x128xf32>
    %22 = arith.addf %19, %21 : vector<8x128xf32>
    %cst_17 = arith.constant 0.000000e+00 : f32
    %23 = vector.broadcast %cst_17 : f32 to vector<8x128xf32>
    %24 = arith.maximumf %22, %23 : vector<8x128xf32>
    %25 = arith.truncf %24 : vector<8x128xf32> to vector<8x128xbf16>
    %c0_18 = arith.constant 0 : index
    %c0_19 = arith.constant 0 : index
    %26 = vector.load %arg8[%c0_18, %c0_19] : memref<128x128xbf16, #tpu.memory_space<vmem>>, vector<128x128xbf16>
    %cst_20 = arith.constant dense<0.000000e+00> : vector<8x128xf32>
    %27 = tpu.matmul %25, %26, %cst_20 {dimension_numbers = #tpu.dot_dimension_numbers<[1], [0], [0], [1], [0, 0, 1, 1], [], []>} : vector<8x128xbf16>, vector<128x128xbf16>, vector<8x128xf32> -> vector<8x128xf32>
    %c0_21 = arith.constant 0 : index
    %c0_22 = arith.constant 0 : index
    %28 = vector.load %arg9[%c0_21, %c0_22] : memref<1x128xf32, #tpu.memory_space<vmem>>, vector<1x128xf32>
    %29 = vector.broadcast %28 : vector<1x128xf32> to vector<8x128xf32>
    %30 = arith.addf %27, %29 : vector<8x128xf32>
    %c0_23 = arith.constant 0 : index
    %c0_24 = arith.constant 0 : index
    %31 = vector.load %arg10[%c0_23, %c0_24] : memref<8x128xf32, #tpu.memory_space<vmem>>, vector<8x128xf32>
    tpu.vector_store %arg10[%c0_23, %c0_24], %30 {strides = array<i32>} : memref<8x128xf32, #tpu.memory_space<vmem>>, vector<8x128xf32>,
    return
  }
  func.func @transform_0(%arg0: i32) -> (i32, i32) {
    %c0_i32 = arith.constant 0 : i32
    %c0_i32_0 = arith.constant 0 : i32
    return %arg0, %c0_i32 : i32, i32
  }
  func.func @transform_1(%arg0: i32) -> (i32, i32) {
    %c0_i32 = arith.constant 0 : i32
    %c0_i32_0 = arith.constant 0 : i32
    %c0_i32_1 = arith.constant 0 : i32
    return %c0_i32, %c0_i32_0 : i32, i32
  }
  func.func @transform_2(%arg0: i32) -> (i32, i32) {
    %c0_i32 = arith.constant 0 : i32
    %c0_i32_0 = arith.constant 0 : i32
    %c0_i32_1 = arith.constant 0 : i32
    return %c0_i32, %c0_i32_0 : i32, i32
  }
  func.func @transform_3(%arg0: i32) -> (i32, i32) {
    %c0_i32 = arith.constant 0 : i32
    %c0_i32_0 = arith.constant 0 : i32
    %c0_i32_1 = arith.constant 0 : i32
    return %c0_i32, %c0_i32_0 : i32, i32
  }
  func.func @transform_4(%arg0: i32) -> (i32, i32) {
    %c0_i32 = arith.constant 0 : i32
    %c0_i32_0 = arith.constant 0 : i32
    %c0_i32_1 = arith.constant 0 : i32
    return %c0_i32, %c0_i32_0 : i32, i32
  }
  func.func @transform_5(%arg0: i32) -> (i32, i32) {
    %c0_i32 = arith.constant 0 : i32
    %c0_i32_0 = arith.constant 0 : i32
    %c0_i32_1 = arith.constant 0 : i32
    return %c0_i32, %c0_i32_0 : i32, i32
  }
  func.func @transform_6(%arg0: i32) -> (i32, i32) {
    %c0_i32 = arith.constant 0 : i32
    %c0_i32_0 = arith.constant 0 : i32
    %c0_i32_1 = arith.constant 0 : i32
    return %c0_i32, %c0_i32_0 : i32, i32
  }
  func.func @transform_7(%arg0: i32) -> (i32, i32) {
    %c0_i32 = arith.constant 0 : i32
    %c0_i32_0 = arith.constant 0 : i32
    %c0_i32_1 = arith.constant 0 : i32
    return %c0_i32, %c0_i32_0 : i32, i32
  }
  func.func @transform_8(%arg0: i32) -> (i32, i32) {
    %c0_i32 = arith.constant 0 : i32
    %c0_i32_0 = arith.constant 0 : i32
    %c0_i32_1 = arith.constant 0 : i32
    return %c0_i32, %c0_i32_0 : i32, i32
  }
  func.func @transform_9(%arg0: i32) -> (i32, i32) {
    %c0_i32 = arith.constant 0 : i32
    %c0_i32_0 = arith.constant 0 : i32
    return %arg0, %c0_i32 : i32, i32
  }
}

</mosaic_0001>

<bundles_post_ra>
// kernel: tpu_custom_call.1
= control target key start
LH: loop header
LB: loop body
LE: loop exit
PB: predicated region body
PF: predicated region fallthrough
CT: control target
= control target key end

     0   :  { %s1539_s0 = inlined_call_operand.hbm [shape: f32[16,32], index: 0, kind: input, shape index: {}]   ;;  %s1540_s1 = inlined_call_operand.hbm [shape: bf16[32,128], index: 1, kind: input, shape index: {}]   ;;  %s1541_s2 = inlined_call_operand.vmem [shape: f32[1,128], index: 2, kind: input, shape index: {}]   ;;  %s1542_s3 = inlined_call_operand.hbm [shape: bf16[128,128], index: 3, kind: input, shape index: {}]   ;;  %s1543_s4 = inlined_call_operand.vmem [shape: f32[1,128], index: 4, kind: input, shape index: {}]   ;;  %s1544_s5 = inlined_call_operand.hbm [shape: bf16[128,128], index: 5, kind: input, shape index: {}]   ;;  %s1545_s6 = inlined_call_operand.vmem [shape: f32[1,128], index: 6, kind: input, shape index: {}]   ;;  %s1546_s7 = inlined_call_operand.hbm [shape: bf16[128,128], index: 7, kind: input, shape index: {}]   ;;  %s1547_s8 = inlined_call_operand.vmem [shape: f32[1,128], index: 8, kind: input, shape index: {}]   ;;  %s1548_s9 = inlined_call_operand.hbm [shape: f32[16,128], index: 9, kind: output, shape index: {}]  }
   0x1   :  { %1549 = sst [smem:[#allocation16_spill]] %s1540_s1 }
   0x2   :  { %1550 = sst [smem:[#allocation17_spill]] %s1542_s3 }
   0x3   :  { %1551 = sst [smem:[#allocation18_spill]] %s1544_s5 }
   0x4   :  { %1552 = sst [smem:[#allocation19_spill]] %s1546_s7 }
   0x5   :  { %14 = vsyncpa [#allocation3], 0 }
   0x6   :  { %16 = vsyncpa [#allocation3 + $0x1], 0 }
   0x7   :  { %17 = vsyncpa [#allocation6], 0 }
   0x8   :  { %18 = vsyncpa [#allocation9], 0 }
   0x9   :  { %19 = vsyncpa [#allocation4], 0 }
   0xa   :  { %21 = vsyncpa [#allocation4 + $0x1], 0  ;;  %s1356_s30 = smov 0   ;;  %s1358_s10 = smov 0  }
   0xb   :  { %s1360_s11 = smov 0   ;;  %s1362_s12 = smov 0  }
   0xc LB: > { %s1553_s1 = sld [smem:[#allocation16_spill]]  ;;  %s1380_s16 = sadd.s32 4294967295, %s1298_s12   ;;  %s1298_s12 = sphi %s1362_s12, %s1568_s12   ;;  %s1294_s11 = sphi %s1360_s11, %s1567_s11   ;;  %s1290_s10 = sphi %s1358_s10, %s1566_s10   ;;  %s1286_s30 = sphi %s1356_s30, %s1565_s30  }
   0xd   : > { %p831_p0 = scmp.ge.s32.totalorder %s1298_s12, 1  ;;  %p48_p1 = scmp.eq.s32.totalorder %s1380_s16, 0 }
   0xe   : > { %p252_p2 = scmp.lt.s32.totalorder %s1298_s12, 3  ;;  %s1300_s18 = smov [#allocation5]  }
   0xf   : > { %s265_s19 = sshll.u32 %s1300_s18, 4  ;;  %s1555_s5 = sld [smem:[#allocation18_spill]]  ;;  %s266_s19 = int_to_ptr.vmem [resolvable:$true] %s265_s19 }
  0x10   : > { %p1385_p3 = pnand %p831_p0, %p252_p2  ;;  %s1557_s3 = sld [smem:[#allocation17_spill]] }
  0x11   : > { %s1301_s27 = smov [#allocation8]   ;;  %s1302_s29 = smov 64  }
  0x12   : > { %s263_s15 = sshll.u32 %s1553_s1, 4  ;;  %p1001_p4 = pneg %p1385_p3  ;;  %s264_s15 = int_to_ptr.hbm [resolvable:$true] %s263_s15 }
  0x13   : > { %s299_s28 = sshll.u32 %s1301_s27, 4  ;;  %s1303_s13 = smov 4   ;;  %s300_s28 = int_to_ptr.vmem [resolvable:$true] %s299_s28 }
  0x14   : > { %p1397_p6 = pnand %p1001_p4, %p48_p1  ;;  %s1558_s7 = sld [smem:[#allocation19_spill]] }
  0x15   : > { %s297_s22 = sshll.u32 %s1555_s5, 4  ;;  %s1304_s21 = smov [#allocation7]   ;;  %s298_s22 = int_to_ptr.hbm [resolvable:$true] %s297_s22 }
  0x16   : > { %s280_s26 = sshll.u32 %s1557_s3, 4  ;;  %s282_s24 = sshll.u32 %s1304_s21, 4  ;;  %s281_s26 = int_to_ptr.hbm [resolvable:$true] %s280_s26  ;;  %s283_s24 = int_to_ptr.vmem [resolvable:$true] %s282_s24 }
  0x17   : > { %1004 = dma.hbm_to_vmem [thread:$0]  (!%p1397_p6), %s264_s15, 256, %s266_s19, [#allocation6], %s1302_s29, %s1302_s29, %s1303_s13  }
  0x18   : > { %1010 = dma.hbm_to_vmem [thread:$0]  (!%p1397_p6), %s298_s22, 1024, %s300_s28, [#allocation9], %s1302_s29, %s1302_s29, %s1303_s13  }
  0x19   : > { %1007 = dma.hbm_to_vmem [thread:$0]  (!%p1397_p6), %s281_s26, 1024, %s283_s24, [#allocation6], %s1302_s29, %s1302_s29, %s1303_s13  }
  0x1a   : > { %s314_s20 = sshll.u32 %s1558_s7, 4  ;;  %s1305_s15 = smov [#allocation10]   ;;  %s315_s20 = int_to_ptr.hbm [resolvable:$true] %s314_s20 }
  0x1b   : > { %s316_s19 = sshll.u32 %s1305_s15, 4  ;;  %s830_s22 = sadd.s32 4294967294, %s1298_s12   ;;  %s317_s19 = int_to_ptr.vmem [resolvable:$true] %s316_s19 }
  0x1c   : > { %1013 = dma.hbm_to_vmem [thread:$0]  (!%p1397_p6), %s315_s20, 1024, %s317_s19, [#allocation9], %s1302_s29, %s1302_s29, %s1303_s13  }
  0x1d   : > { %s1417_s25 = sadd.s32 1, %s1298_s12   ;;  %s34_s28 = sadd.s32 1, %s1294_s11 }
  0x1e   : > { %s31_s27 = ssub.s32 %s1298_s12, %s1417_s25  ;;  %p41_p8 = scmp.ne.s32.totalorder %s1294_s11, %s1290_s10 }
  0x1f   : > { %p32_p7 = scmp.eq.s32.totalorder %s31_s27, 0  ;;  %p42_p9 = scmp.eq.s32.totalorder %s1298_s12, 0 }
  0x20   : > { %p47_p10 = scmp.ne.s32.totalorder %s1290_s10, %s1286_s30  ;;  %p239_p13 = scmp.eq.s32.totalorder %s1380_s16, 1 }
  0x21   : > { %s1428_s26 = scalar_select %p32_p7, %s1294_s11, %s34_s28  }
  0x22   : > { %p1430_p11 = por %p42_p9, %p41_p8  ;;  %p1436_p12 = por %p48_p1, %p47_p10 }
  0x23   : > { %p245_p0 = scmp.eq.s32.totalorder %s830_s22, 1  ;;  %p1026_p2 = scmp.lt.s32.totalorder %s1298_s12, 2 }
  0x24   : > { %s333_s29 = sand.u32 1, %s1294_s11   ;;  %p1443_p4 = por %p239_p13, %p41_p8 }
  0x25   : > { %p1447_p6 = por %p245_p0, %p47_p10  ;;  %s837_s20 = sshll.u32 %s333_s29, 3 }
  0x26   : > { %s838_s21 = sshll.u32 %s1298_s12, 3  ;;  %s337_s27 = scalar_lea.vmem [#allocation2], %s837_s20 }
  0x27   : > { %s341_s19 = scalar_lea.hbm %s1539_s0, %s838_s21  ;;  %s345_s28 = sshll.u32 %s337_s27, 4  ;;  %s346_s28 = int_to_ptr.vmem [resolvable:$true] %s345_s28 }
  0x28   : > { %s343_s1 = sshll.u32 %s341_s19, 4  ;;  %p1457_p7 = pnand %p1026_p2, %p1430_p11  ;;  %s344_s1 = int_to_ptr.hbm [resolvable:$true] %s343_s1 }
  0x29   : > { %s334_s3 = scalar_lea.sflag [#allocation3], %s333_s29  ;;  %s1194_s5 = sshra.s32 %s344_s1, 4  ;;  %s1195_s5 = int_to_ptr.hbm [resolvable:$true] %s1194_s5 }
  0x2a   : > { %s1196_s7 = scalar_lea.hbm %s1195_s5, 8  ;;  %p1198_p9 = pneg %p1457_p7 }
  0x2b   : > { %p1197_p8 = scmp.ne.s32.totalorder %s1195_s5, %s1196_s7  ;;  %s1201_s24 = scalar_lea.hbm %s1539_s0, 16 }
  0x2c   : > { %p1202_p11 = scmp.lt.s32.totalorder %s1195_s5, %s1539_s0  ;;  %p1203_p0 = scmp.lt.s32.totalorder %s1201_s24, %s1196_s7 }
  0x2d   : > { %p1199_p10 = pnand %p1198_p9, %p1197_p8 }
  0x2e   : > { %p1204_p2 = por %p1203_p0, %p1202_p11 }
  0x2f   : > { %p1200_p13 = pneg %p1199_p10 }
  0x31   : > { %p1205_p5 = pnand %p1204_p2, %p1200_p13 }
  0x33   : > { %1208 = shalt.err (!%p1205_p5)
}
  0x34   : > { %1017 = dma.hbm_to_vmem [thread:$0]  (!%p1457_p7), %s344_s1, 128, %s346_s28, %s334_s3  }
  0x35   : > { %354 = sbr.rel (%p1385_p3) target bundleno = 613 (0x265), region = 56  ;;  %s1474_s29 = sand.u32 (!%p1385_p3), 1, %s1290_s10  }
  0x36   : > { %s840_s19 = sshll.u32 (!%p1385_p3), %s1474_s29, 3  ;;  %s357_s27 = scalar_lea.sflag (!%p1385_p3), [#allocation3], %s1474_s29 }
  0x37   : > { %s360_s5 = scalar_lea.vmem (!%p1385_p3), [#allocation2], %s840_s19 }
  0x3a   : > { %1269 = dma.done.wait (%p1436_p12), %s357_s27, 128  }
  0x3b   : > { %1271 = vsyncadd (%p1436_p12), %s357_s27, 4294967168 }
  0x3c   : > { %1273 = dma.done.wait (%p48_p1), [#allocation6], 1280  }
  0x3d   : > { %1275 = vsyncadd (%p48_p1), [#allocation6], 4294966016 }
  0x3e   : > { %1277 = dma.done.wait (%p48_p1), [#allocation9], 2048  }
  0x3f   : > { %1279 = vsyncadd (%p48_p1), [#allocation9], 4294965248  ;;  %v956_v0 = vld [vmem:[#allocation5 + $0x8] sm:$0xff]  ;;  %v955_v2 = vld [vmem:[#allocation5] sm:$0xff]  ;;  %vm439_vm0 = vcmask 261120   ;;  %s952_s22 = sshll.u32 %s1380_s16, 3 }
  0x40   : > { %v964_v1 = vld [vmem:[#allocation7 + $0x38] sm:$0xff]  ;;  %449 = vmatpush.bf16.msra.mxu0 %v956_v0  ;;  %v417_v3 = vld [vmem:[%s360_s5] sm:$0xff]  ;;  %v963_v4 = vld [vmem:[#allocation7 + $0x30] sm:$0xff]  ;;  %s717_s24 = scalar_lea.hbm %s1548_s9, %s952_s22  ;;  %s415_s27 = scalar_lea.vmem [#allocation11], %s840_s19 }
  0x41   : > { %526 = vmatpush.bf16.msra.mxu1 %v964_v1  ;;  %v418_v5 = vpack.c.bf16 %v417_v3, %v417_v3  ;;  %v962_v6 = vld [vmem:[#allocation7 + $0x28] sm:$0xff]  ;;  %v961_v7 = vld [vmem:[#allocation7 + $0x20] sm:$0xff]  ;;  %v960_v8 = vld [vmem:[#allocation7 + $0x18] sm:$0xff]  ;;  %s719_s5 = sshll.u32 %s415_s27, 4  ;;  %s721_s1 = sshll.u32 %s717_s24, 4  ;;  %s720_s5 = int_to_ptr.vmem [resolvable:$true] %s719_s5  ;;  %s722_s1 = int_to_ptr.hbm [resolvable:$true] %s721_s1 }
  0x42   : > { %v959_v9 = vld [vmem:[#allocation7 + $0x10] sm:$0xff]  ;;  %v958_v10 = vld [vmem:[#allocation7 + $0x8] sm:$0xff]  ;;  %v957_v11 = vld [vmem:[#allocation7] sm:$0xff]  ;;  %s707_s3 = scalar_lea.sflag [#allocation4], %s1474_s29  ;;  %s1238_s16 = sshra.s32 %s722_s1, 4  ;;  %s1239_s16 = int_to_ptr.hbm [resolvable:$true] %s1238_s16 }
  0x43   : > { %v972_v12 = vld [vmem:[#allocation8 + $0x38] sm:$0xff]  ;;  %v971_v13 = vld [vmem:[#allocation8 + $0x30] sm:$0xff]  ;;  %v970_v14 = vld [vmem:[#allocation8 + $0x28] sm:$0xff]  ;;  %s1240_s7 = scalar_lea.hbm %s1239_s16, 8  ;;  %s1244_s28 = scalar_lea.hbm %s1548_s9, 16 }
  0x44   : > { %450 = vmatpush.bf16.msra.mxu0 %v955_v2  ;;  %609 = vmatpush.bf16.msra.mxu2 %v972_v12  ;;  %v969_v15 = vld [vmem:[#allocation8 + $0x20] sm:$0xff]  ;;  %v968_v16 = vld [vmem:[#allocation8 + $0x18] sm:$0xff]  ;;  %v967_v17 = vld [vmem:[#allocation8 + $0x10] sm:$0xff]  ;;  %p1241_p1 = scmp.ne.s32.totalorder %s1239_s16, %s1240_s7  ;;  %p1245_p12 = scmp.lt.s32.totalorder %s1239_s16, %s1548_s9 }
  0x45   : > { %527 = vmatpush.bf16.msra.mxu1 %v963_v4  ;;  %v1070_v18 = vld [vmem:[%s1541_s2] ss:$0 sm:$0xff]  ;;  %v966_v24 = vld [vmem:[#allocation8 + $0x8] sm:$0xff]  ;;  %v980_v26 = vld [vmem:[#allocation10 + $0x38] sm:$0xff]  ;;  %p1246_p7 = scmp.lt.s32.totalorder %s1244_s28, %s1240_s7 }
  0x46   : > { %v965_v25 = vld [vmem:[#allocation8] sm:$0xff]  ;;  %692 = vmatpush.bf16.msra.mxu3 %v980_v26  ;;  %v979_v27 = vld [vmem:[#allocation10 + $0x30] sm:$0xff]  ;;  %v978_v28 = vld [vmem:[#allocation10 + $0x28] sm:$0xff]  ;;  %p1242_p3 = pnand %p1241_p1, %p1443_p4 }
  0x47   : > { %854 = vmatmul.msk.bf16.vlgmr.msra.gmra.mxu0 %vm439_vm0, %v418_v5  ;;  %v977_v29 = vld [vmem:[#allocation10 + $0x20] sm:$0xff]  ;;  %v976_v30 = vld [vmem:[#allocation10 + $0x18] sm:$0xff]  ;;  %v975_v31 = vld [vmem:[#allocation10 + $0x10] sm:$0xff]  ;;  %p1247_p8 = por %p1246_p7, %p1245_p12 }
  0x48   : > { %610 = vmatpush.bf16.msra.mxu2 %v971_v13  ;;  %v1071_v32 = vld [vmem:[%s1543_s4] ss:$0 sm:$0xff]  ;;  %v974_v38 = vld [vmem:[#allocation10 + $0x8] sm:$0xff]  ;;  %p1243_p5 = pneg %p1242_p3 }
  0x49   : > { %528 = vmatpush.bf16.msra.mxu1 %v962_v6  ;;  %v973_v39 = vld [vmem:[#allocation10] sm:$0xff] }
  0x4a   : > { %693 = vmatpush.bf16.msra.mxu3 %v979_v27  ;;  %v1072_v40 = vld [vmem:[%s1545_s6] ss:$0 sm:$0xff]  ;;  %p1248_p9 = pnand %p1247_p8, %p1243_p5 }
  0x4b   : > { %v1073_v46 = vld [vmem:[%s1547_s8] ss:$0 sm:$0xff] }
  0x4c   : > { %611 = vmatpush.bf16.msra.mxu2 %v970_v14 }
  0x4d   : > { %529 = vmatpush.bf16.msra.mxu1 %v961_v7 }
  0x4e   : > { %694 = vmatpush.bf16.msra.mxu3 %v978_v28 }
  0x50   : > { %612 = vmatpush.bf16.msra.mxu2 %v969_v15 }
  0x51   : > { %530 = vmatpush.bf16.msra.mxu1 %v960_v8 }
  0x52   : > { %695 = vmatpush.bf16.msra.mxu3 %v977_v29 }
  0x54   : > { %613 = vmatpush.bf16.msra.mxu2 %v968_v16 }
  0x55   : > { %531 = vmatpush.bf16.msra.mxu1 %v959_v9 }
  0x56   : > { %696 = vmatpush.bf16.msra.mxu3 %v976_v30 }
  0x58   : > { %614 = vmatpush.bf16.msra.mxu2 %v967_v17 }
  0x59   : > { %532 = vmatpush.bf16.msra.mxu1 %v958_v10 }
  0x5a   : > { %697 = vmatpush.bf16.msra.mxu3 %v975_v31 }
  0x5c   : > { %615 = vmatpush.bf16.msra.mxu2 %v966_v24 }
  0x5d   : > { %533 = vmatpush.bf16.msra.mxu1 %v957_v11 }
  0x5e   : > { %698 = vmatpush.bf16.msra.mxu3 %v974_v38 }
  0x60   : > { %616 = vmatpush.bf16.msra.mxu2 %v965_v25 }
  0x62   : > { %699 = vmatpush.bf16.msra.mxu3 %v973_v39 }
  0xc4   : > { %v452_v19 = vpop.f32.mrf.mxu0 }
  0xc5   : > { %v453_v20 = vadd.f32 %v1070_v18, %v452_v19 }
  0xc7   : > { %v456_v21 = vmax.f32 %v453_v20, 0.0 }
  0xc9   : > { %v457_v22 = vpack.c.bf16 %v456_v21, %v456_v21 }
  0xcb   : > { %534 = vmatmul.bf16.vlgmr.msra.gmra.mxu1 %v457_v22 }
  0xcc   : > { %v454_v23 = vpop.f32.mrf.mxu0 }
 0x148   : > { %v535_v33 = vpop.f32.mrf.mxu1 }
 0x149   : > { %v536_v34 = vadd.f32 %v1071_v32, %v535_v33 }
 0x14b   : > { %v539_v35 = vmax.f32 %v536_v34, 0.0 }
 0x14d   : > { %v540_v36 = vpack.c.bf16 %v539_v35, %v539_v35 }
 0x14f   : > { %617 = vmatmul.bf16.vlgmr.msra.gmra.mxu2 %v540_v36 }
 0x150   : > { %v537_v37 = vpop.f32.mrf.mxu1 }
 0x1d2   : > { %v618_v41 = vpop.f32.mrf.mxu2 }
 0x1d3   : > { %v619_v42 = vadd.f32 %v1072_v40, %v618_v41 }
 0x1d5   : > { %v622_v43 = vmax.f32 %v619_v42, 0.0 }
 0x1d7   : > { %v623_v44 = vpack.c.bf16 %v622_v43, %v622_v43 }
 0x1d9   : > { %700 = vmatmul.bf16.vlgmr.msra.gmra.mxu3 %v623_v44 }
 0x1da   : > { %v620_v45 = vpop.f32.mrf.mxu2 }
 0x25c   : > { %v701_v47 = vpop.f32.mrf.mxu3 }
 0x25d   : > { %v702_v48 = vadd.f32 %v1073_v46, %v701_v47 }
 0x25f   : > { %705 = vst [vmem:[%s415_s27] sm:$0xff] %v702_v48 }
 0x260   : > { %1251 = shalt.err (!%p1248_p9)
}
 0x261   : > { %999 = dma.vmem_to_hbm [thread:$0]  (%p1443_p4), %s720_s5, 128, %s722_s1, %s707_s3  }
 0x264   : > { %v703_v49 = vpop.f32.mrf.mxu3 }
 0x265 PF: > { %s733_s29 = sand.u32 1, %s1286_s30   ;;  %p1564_p10 = scmp.ge.s32.totalorder %s1298_s12, 2 }
 0x266   : > { %s734_s20 = scalar_lea.sflag [#allocation4], %s733_s29 }
 0x267   : > { %p1019_p13 = pnand %p1564_p10, %p1447_p6 }
 0x269   : > { %p1020_p11 = pneg %p1019_p13 }
 0x26b   : > { %1281 = dma.done.wait (%p1020_p11), %s734_s20, 128  }
 0x26c   : > { %1283 = vsyncadd (%p1020_p11), %s734_s20, 4294967168  ;;  %p24_p0 = scmp.ge.s32.totalorder %s1417_s25, 4   ;;  %s1565_s30 = smov %s1290_s10 }
 0x26d   : > { %s1566_s10 = smov %s1294_s11  ;;  %s1567_s11 = smov %s1428_s26 }
 0x26e   : > { %s1568_s12 = smov %s1417_s25  ;;  %26 = sbr.rel (!%p24_p0) target bundleno = 12 (0xc), region = 117 }
 0x273   :  { %740 = vsyncpa [#allocation3], 1 }
 0x274   :  { %742 = vsyncpa [#allocation3 + $0x1], 1 }
 0x275   :  { %743 = vsyncpa [#allocation6], 1 }
 0x276   :  { %744 = vsyncpa [#allocation9], 1 }
 0x277   :  { %745 = vsyncpa [#allocation4], 1 }
 0x278   :  { %747 = vsyncpa [#allocation4 + $0x1], 1 }

// kernel: tpu_custom_call.1
= control target key start
LH: loop header
LB: loop body
LE: loop exit
PB: predicated region body
PF: predicated region fallthrough
CT: control target
= control target key end

     0   :  { %s1539_s0 = inlined_call_operand.hbm [shape: f32[16,32], index: 0, kind: input, shape index: {}]   ;;  %s1540_s1 = inlined_call_operand.hbm [shape: bf16[32,128], index: 1, kind: input, shape index: {}]   ;;  %s1541_s2 = inlined_call_operand.vmem [shape: f32[1,128], index: 2, kind: input, shape index: {}]   ;;  %s1542_s3 = inlined_call_operand.hbm [shape: bf16[128,128], index: 3, kind: input, shape index: {}]   ;;  %s1543_s4 = inlined_call_operand.vmem [shape: f32[1,128], index: 4, kind: input, shape index: {}]   ;;  %s1544_s5 = inlined_call_operand.hbm [shape: bf16[128,128], index: 5, kind: input, shape index: {}]   ;;  %s1545_s6 = inlined_call_operand.vmem [shape: f32[1,128], index: 6, kind: input, shape index: {}]   ;;  %s1546_s7 = inlined_call_operand.hbm [shape: bf16[128,128], index: 7, kind: input, shape index: {}]   ;;  %s1547_s8 = inlined_call_operand.vmem [shape: f32[1,128], index: 8, kind: input, shape index: {}]   ;;  %s1548_s9 = inlined_call_operand.hbm [shape: f32[16,128], index: 9, kind: output, shape index: {}]  }
   0x1   :  { %1549 = sst [smem:[#allocation16_spill]] %s1540_s1 }
   0x2   :  { %1550 = sst [smem:[#allocation17_spill]] %s1542_s3 }
   0x3   :  { %1551 = sst [smem:[#allocation18_spill]] %s1544_s5 }
   0x4   :  { %1552 = sst [smem:[#allocation19_spill]] %s1546_s7 }
   0x5   :  { %14 = vsyncpa [#allocation3], 0 }
   0x6   :  { %16 = vsyncpa [#allocation3 + $0x1], 0 }
   0x7   :  { %17 = vsyncpa [#allocation6], 0 }
   0x8   :  { %18 = vsyncpa [#allocation9], 0 }
   0x9   :  { %19 = vsyncpa [#allocation4], 0 }
   0xa   :  { %21 = vsyncpa [#allocation4 + $0x1], 0  ;;  %s1356_s30 = smov 0   ;;  %s1358_s10 = smov 0  }
   0xb   :  { %s1360_s11 = smov 0   ;;  %s1362_s12 = smov 0  }
   0xc LB: > { %s1553_s1 = sld [smem:[#allocation16_spill]]  ;;  %s1380_s16 = sadd.s32 4294967295, %s1298_s12   ;;  %s1298_s12 = sphi %s1362_s12, %s1568_s12   ;;  %s1294_s11 = sphi %s1360_s11, %s1567_s11   ;;  %s1290_s10 = sphi %s1358_s10, %s1566_s10   ;;  %s1286_s30 = sphi %s1356_s30, %s1565_s30  }
   0xd   : > { %p831_p0 = scmp.ge.s32.totalorder %s1298_s12, 1  ;;  %p48_p1 = scmp.eq.s32.totalorder %s1380_s16, 0 }
   0xe   : > { %p252_p2 = scmp.lt.s32.totalorder %s1298_s12, 3  ;;  %s1300_s18 = smov [#allocation5]  }
   0xf   : > { %s265_s19 = sshll.u32 %s1300_s18, 4  ;;  %s1555_s5 = sld [smem:[#allocation18_spill]]  ;;  %s266_s19 = int_to_ptr.vmem [resolvable:$true] %s265_s19 }
  0x10   : > { %p1385_p3 = pnand %p831_p0, %p252_p2  ;;  %s1557_s3 = sld [smem:[#allocation17_spill]] }
  0x11   : > { %s1301_s27 = smov [#allocation8]   ;;  %s1302_s29 = smov 64  }
  0x12   : > { %s263_s15 = sshll.u32 %s1553_s1, 4  ;;  %p1001_p4 = pneg %p1385_p3  ;;  %s264_s15 = int_to_ptr.hbm [resolvable:$true] %s263_s15 }
  0x13   : > { %s299_s28 = sshll.u32 %s1301_s27, 4  ;;  %s1303_s13 = smov 4   ;;  %s300_s28 = int_to_ptr.vmem [resolvable:$true] %s299_s28 }
  0x14   : > { %p1397_p6 = pnand %p1001_p4, %p48_p1  ;;  %s1558_s7 = sld [smem:[#allocation19_spill]] }
  0x15   : > { %s297_s22 = sshll.u32 %s1555_s5, 4  ;;  %s1304_s21 = smov [#allocation7]   ;;  %s298_s22 = int_to_ptr.hbm [resolvable:$true] %s297_s22 }
  0x16   : > { %s280_s26 = sshll.u32 %s1557_s3, 4  ;;  %s282_s24 = sshll.u32 %s1304_s21, 4  ;;  %s281_s26 = int_to_ptr.hbm [resolvable:$true] %s280_s26  ;;  %s283_s24 = int_to_ptr.vmem [resolvable:$true] %s282_s24 }
  0x17   : > { %1004 = dma.hbm_to_vmem [thread:$0]  (!%p1397_p6), %s264_s15, 256, %s266_s19, [#allocation6], %s1302_s29, %s1302_s29, %s1303_s13  }
  0x18   : > { %1010 = dma.hbm_to_vmem [thread:$0]  (!%p1397_p6), %s298_s22, 1024, %s300_s28, [#allocation9], %s1302_s29, %s1302_s29, %s1303_s13  }
  0x19   : > { %1007 = dma.hbm_to_vmem [thread:$0]  (!%p1397_p6), %s281_s26, 1024, %s283_s24, [#allocation6], %s1302_s29, %s1302_s29, %s1303_s13  }
  0x1a   : > { %s314_s20 = sshll.u32 %s1558_s7, 4  ;;  %s1305_s15 = smov [#allocation10]   ;;  %s315_s20 = int_to_ptr.hbm [resolvable:$true] %s314_s20 }
  0x1b   : > { %s316_s19 = sshll.u32 %s1305_s15, 4  ;;  %s830_s22 = sadd.s32 4294967294, %s1298_s12   ;;  %s317_s19 = int_to_ptr.vmem [resolvable:$true] %s316_s19 }
  0x1c   : > { %1013 = dma.hbm_to_vmem [thread:$0]  (!%p1397_p6), %s315_s20, 1024, %s317_s19, [#allocation9], %s1302_s29, %s1302_s29, %s1303_s13  }
  0x1d   : > { %s1417_s25 = sadd.s32 1, %s1298_s12   ;;  %s34_s28 = sadd.s32 1, %s1294_s11 }
  0x1e   : > { %s31_s27 = ssub.s32 %s1298_s12, %s1417_s25  ;;  %p41_p8 = scmp.ne.s32.totalorder %s1294_s11, %s1290_s10 }
  0x1f   : > { %p32_p7 = scmp.eq.s32.totalorder %s31_s27, 0  ;;  %p42_p9 = scmp.eq.s32.totalorder %s1298_s12, 0 }
  0x20   : > { %p47_p10 = scmp.ne.s32.totalorder %s1290_s10, %s1286_s30  ;;  %p239_p13 = scmp.eq.s32.totalorder %s1380_s16, 1 }
  0x21   : > { %s1428_s26 = scalar_select %p32_p7, %s1294_s11, %s34_s28  }
  0x22   : > { %p1430_p11 = por %p42_p9, %p41_p8  ;;  %p1436_p12 = por %p48_p1, %p47_p10 }
  0x23   : > { %p245_p0 = scmp.eq.s32.totalorder %s830_s22, 1  ;;  %p1026_p2 = scmp.lt.s32.totalorder %s1298_s12, 2 }
  0x24   : > { %s333_s29 = sand.u32 1, %s1294_s11   ;;  %p1443_p4 = por %p239_p13, %p41_p8 }
  0x25   : > { %p1447_p6 = por %p245_p0, %p47_p10  ;;  %s837_s20 = sshll.u32 %s333_s29, 3 }
  0x26   : > { %s838_s21 = sshll.u32 %s1298_s12, 3  ;;  %s337_s27 = scalar_lea.vmem [#allocation2], %s837_s20 }
  0x27   : > { %s341_s19 = scalar_lea.hbm %s1539_s0, %s838_s21  ;;  %s345_s28 = sshll.u32 %s337_s27, 4  ;;  %s346_s28 = int_to_ptr.vmem [resolvable:$true] %s345_s28 }
  0x28   : > { %s343_s1 = sshll.u32 %s341_s19, 4  ;;  %p1457_p7 = pnand %p1026_p2, %p1430_p11  ;;  %s344_s1 = int_to_ptr.hbm [resolvable:$true] %s343_s1 }
  0x29   : > { %s334_s3 = scalar_lea.sflag [#allocation3], %s333_s29  ;;  %s1194_s5 = sshra.s32 %s344_s1, 4  ;;  %s1195_s5 = int_to_ptr.hbm [resolvable:$true] %s1194_s5 }
  0x2a   : > { %s1196_s7 = scalar_lea.hbm %s1195_s5, 8  ;;  %p1198_p9 = pneg %p1457_p7 }
  0x2b   : > { %p1197_p8 = scmp.ne.s32.totalorder %s1195_s5, %s1196_s7  ;;  %s1201_s24 = scalar_lea.hbm %s1539_s0, 16 }
  0x2c   : > { %p1202_p11 = scmp.lt.s32.totalorder %s1195_s5, %s1539_s0  ;;  %p1203_p0 = scmp.lt.s32.totalorder %s1201_s24, %s1196_s7 }
  0x2d   : > { %p1199_p10 = pnand %p1198_p9, %p1197_p8 }
  0x2e   : > { %p1204_p2 = por %p1203_p0, %p1202_p11 }
  0x2f   : > { %p1200_p13 = pneg %p1199_p10 }
  0x31   : > { %p1205_p5 = pnand %p1204_p2, %p1200_p13 }
  0x33   : > { %1208 = shalt.err (!%p1205_p5)
}
  0x34   : > { %1017 = dma.hbm_to_vmem [thread:$0]  (!%p1457_p7), %s344_s1, 128, %s346_s28, %s334_s3  }
  0x35   : > { %354 = sbr.rel (%p1385_p3) target bundleno = 613 (0x265), region = 56  ;;  %s1474_s29 = sand.u32 (!%p1385_p3), 1, %s1290_s10  }
  0x36   : > { %s840_s19 = sshll.u32 (!%p1385_p3), %s1474_s29, 3  ;;  %s357_s27 = scalar_lea.sflag (!%p1385_p3), [#allocation3], %s1474_s29 }
  0x37   : > { %s360_s5 = scalar_lea.vmem (!%p1385_p3), [#allocation2], %s840_s19 }
  0x3a   : > { %1269 = dma.done.wait (%p1436_p12), %s357_s27, 128  }
  0x3b   : > { %1271 = vsyncadd (%p1436_p12), %s357_s27, 4294967168 }
  0x3c   : > { %1273 = dma.done.wait (%p48_p1), [#allocation6], 1280  }
  0x3d   : > { %1275 = vsyncadd (%p48_p1), [#allocation6], 4294966016 }
  0x3e   : > { %1277 = dma.done.wait (%p48_p1), [#allocation9], 2048  }
  0x3f   : > { %1279 = vsyncadd (%p48_p1), [#allocation9], 4294965248  ;;  %v956_v0 = vld [vmem:[#allocation5 + $0x8] sm:$0xff]  ;;  %v955_v2 = vld [vmem:[#allocation5] sm:$0xff]  ;;  %vm439_vm0 = vcmask 261120   ;;  %s952_s22 = sshll.u32 %s1380_s16, 3 }
  0x40   : > { %v964_v1 = vld [vmem:[#allocation7 + $0x38] sm:$0xff]  ;;  %449 = vmatpush.bf16.msra.mxu0 %v956_v0  ;;  %v417_v3 = vld [vmem:[%s360_s5] sm:$0xff]  ;;  %v963_v4 = vld [vmem:[#allocation7 + $0x30] sm:$0xff]  ;;  %s717_s24 = scalar_lea.hbm %s1548_s9, %s952_s22  ;;  %s415_s27 = scalar_lea.vmem [#allocation11], %s840_s19 }
  0x41   : > { %526 = vmatpush.bf16.msra.mxu1 %v964_v1  ;;  %v418_v5 = vpack.c.bf16 %v417_v3, %v417_v3  ;;  %v962_v6 = vld [vmem:[#allocation7 + $0x28] sm:$0xff]  ;;  %v961_v7 = vld [vmem:[#allocation7 + $0x20] sm:$0xff]  ;;  %v960_v8 = vld [vmem:[#allocation7 + $0x18] sm:$0xff]  ;;  %s719_s5 = sshll.u32 %s415_s27, 4  ;;  %s721_s1 = sshll.u32 %s717_s24, 4  ;;  %s720_s5 = int_to_ptr.vmem [resolvable:$true] %s719_s5  ;;  %s722_s1 = int_to_ptr.hbm [resolvable:$true] %s721_s1 }
  0x42   : > { %v959_v9 = vld [vmem:[#allocation7 + $0x10] sm:$0xff]  ;;  %v958_v10 = vld [vmem:[#allocation7 + $0x8] sm:$0xff]  ;;  %v957_v11 = vld [vmem:[#allocation7] sm:$0xff]  ;;  %s707_s3 = scalar_lea.sflag [#allocation4], %s1474_s29  ;;  %s1238_s16 = sshra.s32 %s722_s1, 4  ;;  %s1239_s16 = int_to_ptr.hbm [resolvable:$true] %s1238_s16 }
  0x43   : > { %v972_v12 = vld [vmem:[#allocation8 + $0x38] sm:$0xff]  ;;  %v971_v13 = vld [vmem:[#allocation8 + $0x30] sm:$0xff]  ;;  %v970_v14 = vld [vmem:[#allocation8 + $0x28] sm:$0xff]  ;;  %s1240_s7 = scalar_lea.hbm %s1239_s16, 8  ;;  %s1244_s28 = scalar_lea.hbm %s1548_s9, 16 }
  0x44   : > { %450 = vmatpush.bf16.msra.mxu0 %v955_v2  ;;  %609 = vmatpush.bf16.msra.mxu2 %v972_v12  ;;  %v969_v15 = vld [vmem:[#allocation8 + $0x20] sm:$0xff]  ;;  %v968_v16 = vld [vmem:[#allocation8 + $0x18] sm:$0xff]  ;;  %v967_v17 = vld [vmem:[#allocation8 + $0x10] sm:$0xff]  ;;  %p1241_p1 = scmp.ne.s32.totalorder %s1239_s16, %s1240_s7  ;;  %p1245_p12 = scmp.lt.s32.totalorder %s1239_s16, %s1548_s9 }
  0x45   : > { %527 = vmatpush.bf16.msra.mxu1 %v963_v4  ;;  %v1070_v18 = vld [vmem:[%s1541_s2] ss:$0 sm:$0xff]  ;;  %v966_v24 = vld [vmem:[#allocation8 + $0x8] sm:$0xff]  ;;  %v980_v26 = vld [vmem:[#allocation10 + $0x38] sm:$0xff]  ;;  %p1246_p7 = scmp.lt.s32.totalorder %s1244_s28, %s1240_s7 }
  0x46   : > { %v965_v25 = vld [vmem:[#allocation8] sm:$0xff]  ;;  %692 = vmatpush.bf16.msra.mxu3 %v980_v26  ;;  %v979_v27 = vld [vmem:[#allocation10 + $0x30] sm:$0xff]  ;;  %v978_v28 = vld [vmem:[#allocation10 + $0x28] sm:$0xff]  ;;  %p1242_p3 = pnand %p1241_p1, %p1443_p4 }
  0x47   : > { %854 = vmatmul.msk.bf16.vlgmr.msra.gmra.mxu0 %vm439_vm0, %v418_v5  ;;  %v977_v29 = vld [vmem:[#allocation10 + $0x20] sm:$0xff]  ;;  %v976_v30 = vld [vmem:[#allocation10 + $0x18] sm:$0xff]  ;;  %v975_v31 = vld [vmem:[#allocation10 + $0x10] sm:$0xff]  ;;  %p1247_p8 = por %p1246_p7, %p1245_p12 }
  0x48   : > { %610 = vmatpush.bf16.msra.mxu2 %v971_v13  ;;  %v1071_v32 = vld [vmem:[%s1543_s4] ss:$0 sm:$0xff]  ;;  %v974_v38 = vld [vmem:[#allocation10 + $0x8] sm:$0xff]  ;;  %p1243_p5 = pneg %p1242_p3 }
  0x49   : > { %528 = vmatpush.bf16.msra.mxu1 %v962_v6  ;;  %v973_v39 = vld [vmem:[#allocation10] sm:$0xff] }
  0x4a   : > { %693 = vmatpush.bf16.msra.mxu3 %v979_v27  ;;  %v1072_v40 = vld [vmem:[%s1545_s6] ss:$0 sm:$0xff]  ;;  %p1248_p9 = pnand %p1247_p8, %p1243_p5 }
  0x4b   : > { %v1073_v46 = vld [vmem:[%s1547_s8] ss:$0 sm:$0xff] }
  0x4c   : > { %611 = vmatpush.bf16.msra.mxu2 %v970_v14 }
  0x4d   : > { %529 = vmatpush.bf16.msra.mxu1 %v961_v7 }
  0x4e   : > { %694 = vmatpush.bf16.msra.mxu3 %v978_v28 }
  0x50   : > { %612 = vmatpush.bf16.msra.mxu2 %v969_v15 }
  0x51   : > { %530 = vmatpush.bf16.msra.mxu1 %v960_v8 }
  0x52   : > { %695 = vmatpush.bf16.msra.mxu3 %v977_v29 }
  0x54   : > { %613 = vmatpush.bf16.msra.mxu2 %v968_v16 }
  0x55   : > { %531 = vmatpush.bf16.msra.mxu1 %v959_v9 }
  0x56   : > { %696 = vmatpush.bf16.msra.mxu3 %v976_v30 }
  0x58   : > { %614 = vmatpush.bf16.msra.mxu2 %v967_v17 }
  0x59   : > { %532 = vmatpush.bf16.msra.mxu1 %v958_v10 }
  0x5a   : > { %697 = vmatpush.bf16.msra.mxu3 %v975_v31 }
  0x5c   : > { %615 = vmatpush.bf16.msra.mxu2 %v966_v24 }
  0x5d   : > { %533 = vmatpush.bf16.msra.mxu1 %v957_v11 }
  0x5e   : > { %698 = vmatpush.bf16.msra.mxu3 %v974_v38 }
  0x60   : > { %616 = vmatpush.bf16.msra.mxu2 %v965_v25 }
  0x62   : > { %699 = vmatpush.bf16.msra.mxu3 %v973_v39 }
  0xc4   : > { %v452_v19 = vpop.f32.mrf.mxu0 }
  0xc5   : > { %v453_v20 = vadd.f32 %v1070_v18, %v452_v19 }
  0xc7   : > { %v456_v21 = vmax.f32 %v453_v20, 0.0 }
  0xc9   : > { %v457_v22 = vpack.c.bf16 %v456_v21, %v456_v21 }
  0xcb   : > { %534 = vmatmul.bf16.vlgmr.msra.gmra.mxu1 %v457_v22 }
  0xcc   : > { %v454_v23 = vpop.f32.mrf.mxu0 }
 0x148   : > { %v535_v33 = vpop.f32.mrf.mxu1 }
 0x149   : > { %v536_v34 = vadd.f32 %v1071_v32, %v535_v33 }
 0x14b   : > { %v539_v35 = vmax.f32 %v536_v34, 0.0 }
 0x14d   : > { %v540_v36 = vpack.c.bf16 %v539_v35, %v539_v35 }
 0x14f   : > { %617 = vmatmul.bf16.vlgmr.msra.gmra.mxu2 %v540_v36 }
 0x150   : > { %v537_v37 = vpop.f32.mrf.mxu1 }
 0x1d2   : > { %v618_v41 = vpop.f32.mrf.mxu2 }
 0x1d3   : > { %v619_v42 = vadd.f32 %v1072_v40, %v618_v41 }
 0x1d5   : > { %v622_v43 = vmax.f32 %v619_v42, 0.0 }
 0x1d7   : > { %v623_v44 = vpack.c.bf16 %v622_v43, %v622_v43 }
 0x1d9   : > { %700 = vmatmul.bf16.vlgmr.msra.gmra.mxu3 %v623_v44 }
 0x1da   : > { %v620_v45 = vpop.f32.mrf.mxu2 }
 0x25c   : > { %v701_v47 = vpop.f32.mrf.mxu3 }
 0x25d   : > { %v702_v48 = vadd.f32 %v1073_v46, %v701_v47 }
 0x25f   : > { %705 = vst [vmem:[%s415_s27] sm:$0xff] %v702_v48 }
 0x260   : > { %1251 = shalt.err (!%p1248_p9)
}
 0x261   : > { %999 = dma.vmem_to_hbm [thread:$0]  (%p1443_p4), %s720_s5, 128, %s722_s1, %s707_s3  }
 0x264   : > { %v703_v49 = vpop.f32.mrf.mxu3 }
 0x265 PF: > { %s733_s29 = sand.u32 1, %s1286_s30   ;;  %p1564_p10 = scmp.ge.s32.totalorder %s1298_s12, 2 }
 0x266   : > { %s734_s20 = scalar_lea.sflag [#allocation4], %s733_s29 }
 0x267   : > { %p1019_p13 = pnand %p1564_p10, %p1447_p6 }
 0x269   : > { %p1020_p11 = pneg %p1019_p13 }
 0x26b   : > { %1281 = dma.done.wait (%p1020_p11), %s734_s20, 128  }
 0x26c   : > { %1283 = vsyncadd (%p1020_p11), %s734_s20, 4294967168  ;;  %p24_p0 = scmp.ge.s32.totalorder %s1417_s25, 4   ;;  %s1565_s30 = smov %s1290_s10 }
 0x26d   : > { %s1566_s10 = smov %s1294_s11  ;;  %s1567_s11 = smov %s1428_s26 }
 0x26e   : > { %s1568_s12 = smov %s1417_s25  ;;  %26 = sbr.rel (!%p24_p0) target bundleno = 12 (0xc), region = 117 }
 0x273   :  { %740 = vsyncpa [#allocation3], 1 }
 0x274   :  { %742 = vsyncpa [#allocation3 + $0x1], 1 }
 0x275   :  { %743 = vsyncpa [#allocation6], 1 }
 0x276   :  { %744 = vsyncpa [#allocation9], 1 }
 0x277   :  { %745 = vsyncpa [#allocation4], 1 }
 0x278   :  { %747 = vsyncpa [#allocation4 + $0x1], 1 }

</bundles_post_ra>
